<compile_context>
chip_gen: v7x
topology: tpu7x:2x2x1
jax: 0.10.0
libtpu: 0.0.40
codegen_flags: <defaults>
</compile_context>

<pallas_src>
import functools
from math import ceil

import numpy as np
import jax
import jax.numpy as jnp
from jax import lax
from jax.experimental import pallas as pl
from jax.experimental.pallas import tpu as pltpu

# Explicit scoped-VMEM budget: above v5e's 16 MiB default, below v7x's 64 MiB physical.
_VMEM_LIMIT_BYTES = 48 * 1024 * 1024


def _cparams(*semantics):
    return pltpu.CompilerParams(dimension_semantics=semantics,
                                vmem_limit_bytes=_VMEM_LIMIT_BYTES)


def _round_up(x, m):
    return ((x + m - 1) // m) * m


def _softmax_last(s):
    s = s - jnp.max(s, axis=-1, keepdims=True)
    e = jnp.exp(s)
    return e / jnp.sum(e, axis=-1, keepdims=True)


# ----------------------------------------------------------------------------------
# Generic Pallas kernels: linear (x @ W + b), LayerNorm, FeedForward (fused)
# Weights are stored pre-transposed (in_features, out_features); matmuls run bf16 on
# the MXU with f32 accumulation.  Rows are tiled up to 512 with padding (never dropped).
# ----------------------------------------------------------------------------------
def _linear_kernel(x_ref, w_ref, o_ref):
    o_ref[...] = jnp.dot(x_ref[...], w_ref[...],
                         preferred_element_type=jnp.float32).astype(o_ref.dtype)


def _linear_bias_kernel(x_ref, w_ref, b_ref, o_ref):
    acc = jnp.dot(x_ref[...], w_ref[...], preferred_element_type=jnp.float32)
    o_ref[...] = (acc + b_ref[...]).astype(o_ref.dtype)


def pallas_linear(x, w, bias=None, out_dtype=jnp.float32, tm=512):
    M, K = x.shape
    N = w.shape[1]
    tm = min(tm, _round_up(M, 8))
    Mp = _round_up(M, tm)
    xb = x.astype(jnp.bfloat16)
    if Mp != M:
        xb = jnp.pad(xb, ((0, Mp - M), (0, 0)))
    wb = w.astype(jnp.bfloat16)

    if bias is None:
        out = pl.pallas_call(
            _linear_kernel,
            out_shape=jax.ShapeDtypeStruct((Mp, N), out_dtype),
            grid=(Mp // tm,),
            in_specs=[pl.BlockSpec((tm, K), lambda i: (i, 0)),
                      pl.BlockSpec((K, N), lambda i: (0, 0))],
            out_specs=pl.BlockSpec((tm, N), lambda i: (i, 0)),
            compiler_params=_cparams("parallel"),
        )(xb, wb)
    else:
        out = pl.pallas_call(
            _linear_bias_kernel,
            out_shape=jax.ShapeDtypeStruct((Mp, N), out_dtype),
            grid=(Mp // tm,),
            in_specs=[pl.BlockSpec((tm, K), lambda i: (i, 0)),
                      pl.BlockSpec((K, N), lambda i: (0, 0)),
                      pl.BlockSpec((1, N), lambda i: (0, 0))],
            out_specs=pl.BlockSpec((tm, N), lambda i: (i, 0)),
            compiler_params=_cparams("parallel"),
        )(xb, wb, bias.reshape(1, N).astype(jnp.float32))
    return out[:M] if Mp != M else out


def _layernorm_kernel(x_ref, g_ref, b_ref, o_ref, *, eps):
    x = x_ref[...]
    mu = jnp.mean(x, axis=-1, keepdims=True)
    xc = x - mu
    var = jnp.mean(xc * xc, axis=-1, keepdims=True)
    o_ref[...] = (xc * lax.rsqrt(var + eps) * g_ref[...] + b_ref[...]).astype(o_ref.dtype)


def pallas_layernorm(x, g, b, eps=1e-5, tm=512):
    M, D = x.shape
    tm = min(tm, _round_up(M, 8))
    Mp = _round_up(M, tm)
    xp = x.astype(jnp.float32)
    if Mp != M:
        xp = jnp.pad(xp, ((0, Mp - M), (0, 0)))
    out = pl.pallas_call(
        functools.partial(_layernorm_kernel, eps=eps),
        out_shape=jax.ShapeDtypeStruct((Mp, D), jnp.float32),
        grid=(Mp // tm,),
        in_specs=[pl.BlockSpec((tm, D), lambda i: (i, 0)),
                  pl.BlockSpec((1, D), lambda i: (0, 0)),
                  pl.BlockSpec((1, D), lambda i: (0, 0))],
        out_specs=pl.BlockSpec((tm, D), lambda i: (i, 0)),
        compiler_params=_cparams("parallel"),
    )(xp, g.reshape(1, D), b.reshape(1, D))
    return out[:M] if Mp != M else out


def _ffn_kernel(x_ref, w1_ref, b1_ref, w2_ref, b2_ref, o_ref):
    h = jnp.dot(x_ref[...], w1_ref[...], preferred_element_type=jnp.float32) + b1_ref[...]
    h = jax.nn.gelu(h, approximate=False)           # matches torch nn.GELU() (exact erf)
    o_ref[...] = (jnp.dot(h.astype(jnp.bfloat16), w2_ref[...],
                          preferred_element_type=jnp.float32) + b2_ref[...]).astype(o_ref.dtype)


def pallas_ffn(x, w1, b1, w2, b2, tm=512):
    M, D = x.shape
    H = w1.shape[1]
    tm = min(tm, _round_up(M, 8))
    Mp = _round_up(M, tm)
    xb = x.astype(jnp.bfloat16)
    if Mp != M:
        xb = jnp.pad(xb, ((0, Mp - M), (0, 0)))
    out = pl.pallas_call(
        _ffn_kernel,
        out_shape=jax.ShapeDtypeStruct((Mp, D), jnp.float32),
        grid=(Mp // tm,),
        in_specs=[pl.BlockSpec((tm, D), lambda i: (i, 0)),
                  pl.BlockSpec((D, H), lambda i: (0, 0)),
                  pl.BlockSpec((1, H), lambda i: (0, 0)),
                  pl.BlockSpec((H, D), lambda i: (0, 0)),
                  pl.BlockSpec((1, D), lambda i: (0, 0))],
        out_specs=pl.BlockSpec((tm, D), lambda i: (i, 0)),
        compiler_params=_cparams("parallel"),
    )(xb, w1.astype(jnp.bfloat16), b1.reshape(1, H).astype(jnp.float32),
      w2.astype(jnp.bfloat16), b2.reshape(1, D).astype(jnp.float32))
    return out[:M] if Mp != M else out


# ----------------------------------------------------------------------------------
# Nystrom attention kernels (grid over batch only; heads looped inside the kernel)
# ----------------------------------------------------------------------------------
def _landmark_kernel(q_ref, k_ref, seg_ref, ql_ref, kl_ref, a2_ref, *, heads, inv_div):
    # Stage 1: cluster landmarks and attn2 (small outputs only).
    seg = seg_ref[...]                                  # (L, n) one-hot cluster membership
    for h in range(heads):
        qh = q_ref[0, h]                                # (n, d) bf16, q already scaled
        kh = k_ref[0, h]
        qlh = jnp.dot(seg, qh, preferred_element_type=jnp.float32) * inv_div   # (L, d)
        klh = jnp.dot(seg, kh, preferred_element_type=jnp.float32) * inv_div
        ql_ref[0, h] = qlh
        kl_ref[0, h] = klh
        sim2 = jnp.einsum('id,jd->ij', qlh, klh, preferred_element_type=jnp.float32)
        a2_ref[0, h] = _softmax_last(sim2)


def _nystrom_fused_kernel(q_ref, k_ref, v_ref, ql_ref, kl_ref, a2_ref, invd_ref, convw_ref,
                          o_ref, *, heads, pinv_iters, conv_k):
    # Stage 2 (fused): sims 1&3 + softmax + Moore-Penrose pinv + output + residual conv.
    n = q_ref.shape[2]
    L = a2_ref.shape[2]
    inv_denom = invd_ref[0, 0]                          # global pinv-init denominator (SMEM)
    pad = conv_k // 2

    rows = lax.broadcasted_iota(jnp.int32, (L, L), 0)
    cols = lax.broadcasted_iota(jnp.int32, (L, L), 1)
    eye = jnp.where(rows == cols, 1.0, 0.0).astype(jnp.float32)

    for h in range(heads):
        qh = q_ref[0, h]                                # (n, d) bf16 (scaled q)
        kh = k_ref[0, h]
        vh = v_ref[0, h]
        qlh = ql_ref[0, h].astype(jnp.bfloat16)         # (L, d)
        klh = kl_ref[0, h].astype(jnp.bfloat16)

        a1 = _softmax_last(jnp.einsum('nd,ld->nl', qh, klh,
                                      preferred_element_type=jnp.float32))    # (n, L)
        a3 = _softmax_last(jnp.einsum('ld,nd->ln', qlh, kh,
                                      preferred_element_type=jnp.float32))    # (L, n)

        a2 = a2_ref[0, h]                               # (L, L) f32
        z = a2.T * inv_denom
        for _ in range(pinv_iters):
            xz = jnp.dot(a2, z, preferred_element_type=jnp.float32)
            t = 7.0 * eye - xz
            t = 15.0 * eye - jnp.dot(xz, t, preferred_element_type=jnp.float32)
            t = 13.0 * eye - jnp.dot(xz, t, preferred_element_type=jnp.float32)
            z = 0.25 * jnp.dot(z, t, preferred_element_type=jnp.float32)

        m2 = jnp.dot(a3.astype(jnp.bfloat16), vh, preferred_element_type=jnp.float32)   # (L, d)
        m1 = jnp.dot(a1, z, preferred_element_type=jnp.float32)                          # (n, L)
        out_h = jnp.dot(m1.astype(jnp.bfloat16), m2.astype(jnp.bfloat16),
                        preferred_element_type=jnp.float32)                              # (n, d)

        # residual depthwise conv along the (cluster-sorted) token axis, zero-padded edges,
        # implemented with XLU rolls + masks instead of unaligned pad-scratch slices.
        vf = vh.astype(jnp.float32)
        ridx = lax.broadcasted_iota(jnp.int32, vf.shape, 0)
        acc = convw_ref[h, pad] * vf
        for dt in range(1, min(pad, n - 1) + 1):
            fwd = jnp.where(ridx < n - dt, pltpu.roll(vf, shift=n - dt, axis=0), 0.0)  # v[i+dt]
            bwd = jnp.where(ridx >= dt, pltpu.roll(vf, shift=dt, axis=0), 0.0)          # v[i-dt]
            acc = acc + convw_ref[h, pad + dt] * fwd + convw_ref[h, pad - dt] * bwd

        o_ref[0, h] = (out_h + acc).astype(o_ref.dtype)


def nystrom_attention_layer(x_norm, p, seg_bf, divisor, scale, conv_k, pinv_iters,
                            heads, dim_head):
    b, n, dim = x_norm.shape
    inner = heads * dim_head
    L = seg_bf.shape[0]

    # Fold the q scale into the (bias-free) qkv weight (q occupies the first `inner` cols).
    scale_vec = jnp.concatenate([jnp.full((inner,), scale, jnp.float32),
                                 jnp.ones((2 * inner,), jnp.float32)]).astype(p['w_qkv'].dtype)
    w_qkv = p['w_qkv'] * scale_vec[None, :]

    qkv = pallas_linear(x_norm.reshape(b * n, dim), w_qkv, bias=None, out_dtype=jnp.bfloat16)
    qkv = jnp.transpose(qkv.reshape(b, n, 3, heads, dim_head), (2, 0, 3, 1, 4))  # (3,b,h,n,d)
    q, k, v = qkv[0], qkv[1], qkv[2]

    # Stage 1: landmarks + attn2 (only small tensors are written to HBM).
    ql, kl, a2 = pl.pallas_call(
        functools.partial(_landmark_kernel, heads=heads, inv_div=1.0 / float(divisor)),
        out_shape=(jax.ShapeDtypeStruct((b, heads, L, dim_head), jnp.float32),
                   jax.ShapeDtypeStruct((b, heads, L, dim_head), jnp.float32),
                   jax.ShapeDtypeStruct((b, heads, L, L), jnp.float32)),
        grid=(b,),
        in_specs=[pl.BlockSpec((1, heads, n, dim_head), lambda i: (i, 0, 0, 0)),
                  pl.BlockSpec((1, heads, n, dim_head), lambda i: (i, 0, 0, 0)),
                  pl.BlockSpec((L, n), lambda i: (0, 0))],
        out_specs=(pl.BlockSpec((1, heads, L, dim_head), lambda i: (i, 0, 0, 0)),
                   pl.BlockSpec((1, heads, L, dim_head), lambda i: (i, 0, 0, 0)),
                   pl.BlockSpec((1, heads, L, L), lambda i: (i, 0, 0, 0))),
        compiler_params=_cparams("parallel"),
    )(q, k, seg_bf)

    # Global Moore-Penrose init denominator -> a single SMEM scalar (tiny JAX reduction).
    inv_denom = 1.0 / (jnp.max(jnp.sum(jnp.abs(a2), axis=-1)) *
                       jnp.max(jnp.sum(jnp.abs(a2), axis=-2)))
    inv_denom = inv_denom.reshape(1, 1).astype(jnp.float32)

    # Stage 2: fused attention output (attn1/attn3 never round-trip through HBM).
    out_heads = pl.pallas_call(
        functools.partial(_nystrom_fused_kernel, heads=heads,
                          pinv_iters=pinv_iters, conv_k=conv_k),
        out_shape=jax.ShapeDtypeStruct((b, heads, n, dim_head), jnp.bfloat16),
        grid=(b,),
        in_specs=[pl.BlockSpec((1, heads, n, dim_head), lambda i: (i, 0, 0, 0)),
                  pl.BlockSpec((1, heads, n, dim_head), lambda i: (i, 0, 0, 0)),
                  pl.BlockSpec((1, heads, n, dim_head), lambda i: (i, 0, 0, 0)),
                  pl.BlockSpec((1, heads, L, dim_head), lambda i: (i, 0, 0, 0)),
                  pl.BlockSpec((1, heads, L, dim_head), lambda i: (i, 0, 0, 0)),
                  pl.BlockSpec((1, heads, L, L), lambda i: (i, 0, 0, 0)),
                  pl.BlockSpec(memory_space=pltpu.MemorySpace.SMEM),
                  pl.BlockSpec(memory_space=pltpu.MemorySpace.SMEM)],
        out_specs=pl.BlockSpec((1, heads, n, dim_head), lambda i: (i, 0, 0, 0)),
        compiler_params=_cparams("parallel"),
    )(q, k, v, ql, kl, a2, inv_denom, p['conv_w'])

    out = jnp.transpose(out_heads, (0, 2, 1, 3)).reshape(b * n, inner)  # b h n d -> (b n)(h d)
    out = pallas_linear(out, p['w_out'], p['b_out'], out_dtype=jnp.float32)
    return out.reshape(b, n, dim)


# ----------------------------------------------------------------------------------
# Host-side cluster schedule (mirrors the torch.no_grad() sklearn KMeans block)
# ----------------------------------------------------------------------------------
def kmeans_labels(coords, n_clusters, max_iter=10):
    coords = np.asarray(coords, dtype=np.float64)
    n = coords.shape[0]
    centers = [coords[0]]
    for _ in range(1, n_clusters):
        d2 = np.min(((coords[:, None, :] - np.stack(centers)[None]) ** 2).sum(-1), axis=1)
        centers.append(coords[int(np.argmax(d2))])
    centers = np.stack(centers)
    for _ in range(max_iter):
        d2 = ((coords[:, None, :] - centers[None]) ** 2).sum(-1)
        labels = np.argmin(d2, axis=1)
        for c in range(n_clusters):
            pts = coords[labels == c]
            if len(pts) > 0:
                centers[c] = pts.mean(axis=0)
    d2 = ((coords[:, None, :] - centers[None]) ** 2).sum(-1)
    labels = np.argmin(d2, axis=1)
    if np.unique(labels).size < n_clusters:            # safeguard against empty clusters
        labels = (np.arange(n) * n_clusters) // n
    return labels


def build_cluster_schedule(coords, n, m):
    quo = coords.shape[0] // m
    n_clusters = quo + 1
    labels = kmeans_labels(coords, n_clusters)
    index = np.argsort(labels)
    index_ori = np.argsort(index)
    sorted_labels = labels[index]
    seg = (sorted_labels[None, :] == np.arange(n_clusters)[:, None]).astype(np.float32)
    # Reference divides landmark sums by the constant l = ceil(n / num_landmarks)
    # (not by per-cluster size) when no mask is given -- matched here.
    divisor = ceil(n / m)
    return (jnp.asarray(seg), jnp.asarray(index, jnp.int32),
            jnp.asarray(index_ori, jnp.int32), divisor)


# ----------------------------------------------------------------------------------
# Full Nystromformer2D forward
# ----------------------------------------------------------------------------------
def init_params(key, dim, heads, dim_head, conv_k, depth, ff_mult=4):
    inner = heads * dim_head
    layers = []
    for l in range(depth):
        ks = jax.random.split(jax.random.fold_in(key, l), 8)
        layers.append(dict(
            ln1_g=jnp.ones((dim,), jnp.float32),
            ln1_b=jnp.zeros((dim,), jnp.float32),
            # matmul weights stored pre-transposed (in_features, out_features) and in bf16
            w_qkv=(jax.random.normal(ks[0], (dim, 3 * inner), jnp.float32) * 0.05
                   ).astype(jnp.bfloat16),
            w_out=(jax.random.normal(ks[1], (inner, dim), jnp.float32) * 0.05
                   ).astype(jnp.bfloat16),
            b_out=jax.random.normal(ks[2], (dim,), jnp.float32) * 0.02,
            conv_w=jax.random.normal(ks[3], (heads, conv_k), jnp.float32) * 0.05,
            ln2_g=jnp.ones((dim,), jnp.float32),
            ln2_b=jnp.zeros((dim,), jnp.float32),
            w1=(jax.random.normal(ks[4], (dim, ff_mult * dim), jnp.float32) * 0.05
                ).astype(jnp.bfloat16),
            b1=jax.random.normal(ks[5], (ff_mult * dim,), jnp.float32) * 0.02,
            w2=(jax.random.normal(ks[6], (ff_mult * dim, dim), jnp.float32) * 0.05
                ).astype(jnp.bfloat16),
            b2=jax.random.normal(ks[7], (dim,), jnp.float32) * 0.02,
        ))
    return layers


def nystromformer2d_forward(x, coords, layers, *, heads, dim_head, window_h, window_w,
                            pinv_iters=6, conv_k=33):
    b, n, dim = x.shape
    m = window_h * window_w
    seg, index, index_ori, divisor = build_cluster_schedule(np.asarray(coords), n, m)
    scale = dim_head ** -0.5
    seg_bf = seg.astype(jnp.bfloat16)

    # The cluster-sort permutation is layer independent and commutes with every per-token
    # op (LN / linear / FFN / residual); the reference's per-layer sort+unsort therefore
    # telescopes to one sort here and one un-sort at the end (saves 2 gathers per layer).
    x = jnp.take(x, index, axis=1)

    for p in layers:
        # PreNorm + NystromAttention2D + residual
        xn = pallas_layernorm(x.reshape(b * n, dim), p['ln1_g'], p['ln1_b']).reshape(b, n, dim)
        attn_out = nystrom_attention_layer(xn, p, seg_bf, divisor, scale,
                                           conv_k, pinv_iters, heads, dim_head)
        x = attn_out + x
        # PreNorm + FeedForward + residual (dropout p=0.0 -> identity)
        xn = pallas_layernorm(x.reshape(b * n, dim), p['ln2_g'], p['ln2_b'])
        ff_out = pallas_ffn(xn, p['w1'], p['b1'], p['w2'], p['b2']).reshape(b, n, dim)
        x = ff_out + x

    x = jnp.take(x, index_ori, axis=1)
    return x


if __name__ == "__main__":
    B, N, DIM = 2, 16, 32
    HEADS, DIM_HEAD = 2, 8
    WINDOW_H = WINDOW_W = 2          # num_landmarks (cluster target size) m = 4
    DEPTH = 2
    CONV_K = 33                      # default residual_conv_kernel

    key = jax.random.PRNGKey(0)
    kx, kp = jax.random.split(key)
    x = jax.random.normal(kx, (B, N, DIM), jnp.float32)

    side = int(np.sqrt(N))           # 2-D coordinates of the N tokens on a 4x4 grid
    coords = np.stack(np.meshgrid(np.arange(side), np.arange(side), indexing='ij'),
                      axis=-1).reshape(N, 2).astype(np.float32)

    layers = init_params(kp, DIM, HEADS, DIM_HEAD, CONV_K, DEPTH)
    out = nystromformer2d_forward(x, coords, layers, heads=HEADS, dim_head=DIM_HEAD,
                                  window_h=WINDOW_H, window_w=WINDOW_W, conv_k=CONV_K)
    out = jax.block_until_ready(out)
    assert out.shape == (B, N, DIM)
    assert bool(jnp.all(jnp.isfinite(out)))
    print("KERNEL_OK")
</pallas_src>

<mosaic_0001>
module attributes {stable_mosaic.version = 11 : i64} {
  func.func @_layernorm_kernel(%arg0: i32, %arg1: memref<32x32xf32, #tpu.memory_space<vmem>>, %arg2: memref<1x32xf32, #tpu.memory_space<vmem>>, %arg3: memref<1x32xf32, #tpu.memory_space<vmem>>, %arg4: memref<32x32xf32, #tpu.memory_space<vmem>>) attributes {dimension_semantics = [#tpu.dimension_semantics<parallel>], iteration_bounds = array<i64: 1>, scalar_prefetch = 0 : i64, scratch_operands = 0 : i64, tpu.core_type = #tpu.core_type<tc>, window_params = [{transform_indices = @transform_0, window_bounds = array<i64: 32, 32>}, {pipeline_mode = #tpu.pipeline_mode<synchronous>, transform_indices = @transform_1, window_bounds = array<i64: 1, 32>}, {pipeline_mode = #tpu.pipeline_mode<synchronous>, transform_indices = @transform_2, window_bounds = array<i64: 1, 32>}, {transform_indices = @transform_3, window_bounds = array<i64: 32, 32>}]} {
    %c0 = arith.constant 0 : index
    %c0_0 = arith.constant 0 : index
    %0 = vector.load %arg1[%c0, %c0_0] : memref<32x32xf32, #tpu.memory_space<vmem>>, vector<32x32xf32>
    %cst = arith.constant dense<0.000000e+00> : vector<32xf32>
    %1 = vector.multi_reduction <add>, %0, %cst [1] : vector<32x32xf32> to vector<32xf32>
    %2 = vector.shape_cast %1 : vector<32xf32> to vector<32x1xf32>
    %cst_1 = arith.constant 3.200000e+01 : f32
    %3 = vector.broadcast %cst_1 : f32 to vector<32x1xf32>
    %4 = arith.divf %2, %3 : vector<32x1xf32>
    %5 = vector.broadcast %4 : vector<32x1xf32> to vector<32x32xf32>
    %6 = arith.subf %0, %5 : vector<32x32xf32>
    %7 = arith.mulf %6, %6 : vector<32x32xf32>
    %cst_2 = arith.constant dense<0.000000e+00> : vector<32xf32>
    %8 = vector.multi_reduction <add>, %7, %cst_2 [1] : vector<32x32xf32> to vector<32xf32>
    %9 = vector.shape_cast %8 : vector<32xf32> to vector<32x1xf32>
    %cst_3 = arith.constant 3.200000e+01 : f32
    %10 = vector.broadcast %cst_3 : f32 to vector<32x1xf32>
    %11 = arith.divf %9, %10 : vector<32x1xf32>
    %cst_4 = arith.constant 9.99999974E-6 : f32
    %12 = vector.broadcast %cst_4 : f32 to vector<32x1xf32>
    %13 = arith.addf %11, %12 : vector<32x1xf32>
    %14 = math.rsqrt %13 : vector<32x1xf32>
    %15 = vector.broadcast %14 : vector<32x1xf32> to vector<32x32xf32>
    %16 = arith.mulf %6, %15 : vector<32x32xf32>
    %c0_5 = arith.constant 0 : index
    %c0_6 = arith.constant 0 : index
    %17 = vector.load %arg2[%c0_5, %c0_6] : memref<1x32xf32, #tpu.memory_space<vmem>>, vector<1x32xf32>
    %18 = vector.broadcast %17 : vector<1x32xf32> to vector<32x32xf32>
    %19 = arith.mulf %16, %18 : vector<32x32xf32>
    %c0_7 = arith.constant 0 : index
    %c0_8 = arith.constant 0 : index
    %20 = vector.load %arg3[%c0_7, %c0_8] : memref<1x32xf32, #tpu.memory_space<vmem>>, vector<1x32xf32>
    %21 = vector.broadcast %20 : vector<1x32xf32> to vector<32x32xf32>
    %22 = arith.addf %19, %21 : vector<32x32xf32>
    %c0_9 = arith.constant 0 : index
    %c0_10 = arith.constant 0 : index
    %23 = vector.load %arg4[%c0_9, %c0_10] : memref<32x32xf32, #tpu.memory_space<vmem>>, vector<32x32xf32>
    tpu.vector_store %arg4[%c0_9, %c0_10], %22 {strides = array<i32>} : memref<32x32xf32, #tpu.memory_space<vmem>>, vector<32x32xf32>,
    return
  }
  func.func @transform_0(%arg0: i32) -> (i32, i32) {
    %c0_i32 = arith.constant 0 : i32
    %c0_i32_0 = arith.constant 0 : i32
    return %arg0, %c0_i32 : i32, i32
  }
  func.func @transform_1(%arg0: i32) -> (i32, i32) {
    %c0_i32 = arith.constant 0 : i32
    %c0_i32_0 = arith.constant 0 : i32
    %c0_i32_1 = arith.constant 0 : i32
    return %c0_i32, %c0_i32_0 : i32, i32
  }
  func.func @transform_2(%arg0: i32) -> (i32, i32) {
    %c0_i32 = arith.constant 0 : i32
    %c0_i32_0 = arith.constant 0 : i32
    %c0_i32_1 = arith.constant 0 : i32
    return %c0_i32, %c0_i32_0 : i32, i32
  }
  func.func @transform_3(%arg0: i32) -> (i32, i32) {
    %c0_i32 = arith.constant 0 : i32
    %c0_i32_0 = arith.constant 0 : i32
    return %arg0, %c0_i32 : i32, i32
  }
}

</mosaic_0001>

<bundles_post_ra>
// kernel: tpu_custom_call.1
= control target key start
LH: loop header
LB: loop body
LE: loop exit
PB: predicated region body
PF: predicated region fallthrough
CT: control target
= control target key end

     0   :  { %8 = vsyncpa [#allocation3], 0  ;;  %s264_s0 = inlined_call_operand.hbm [shape: f32[32,32], index: 0, kind: input, shape index: {}]   ;;  %s265_s1 = inlined_call_operand.vmem [shape: f32[1,32], index: 1, kind: input, shape index: {}]   ;;  %s266_s2 = inlined_call_operand.vmem [shape: f32[1,32], index: 2, kind: input, shape index: {}]   ;;  %s267_s3 = inlined_call_operand.hbm [shape: f32[32,32], index: 3, kind: output, shape index: {}]  }
   0x1   :  { %9 = vsyncpa [#allocation4], 0  ;;  %s192_s12 = smov [#allocation2]   ;;  %s144_s16 = scalar_lea.hbm %s264_s0, 512 }
   0x2   :  { %s15_s13 = sshll.u32 %s192_s12, 4  ;;  %p145_p0 = scmp.ne.s32.totalorder %s264_s0, %s144_s16  ;;  %s16_s13 = int_to_ptr.vmem [resolvable:$true] %s15_s13 }
   0x3   :  { %p148_p1 = scmp.lt.u32.totalorder %s144_s16, %s264_s0 }
   0x5   :  { %p150_p2 = pnand %p148_p1, %p145_p0 }
   0x7   :  { %153 = shalt.err (!%p150_p2)
}
   0x8   :  { %s154_s21 = scalar_lea.vmem %s16_s13, 512  ;;  %p159_p4 = scmp.lt.s32.totalorder %s16_s13, %s16_s13 }
   0x9   :  { %p155_p3 = scmp.ne.s32.totalorder %s16_s13, %s154_s21  ;;  %p160_p5 = scmp.lt.s32.totalorder %s154_s21, %s154_s21 }
   0xb   :  { %p161_p6 = por %p160_p5, %p159_p4 }
   0xd   :  { %p162_p7 = pnand %p161_p6, %p155_p3 }
   0xf   :  { %165 = shalt.err (!%p162_p7)
}
  0x10   :  { %s193_s22 = smov 128   ;;  %s194_s23 = smov 8  }
  0x11   :  { %21 = dma.hbm_to_vmem [thread:$0]  %s264_s0, 512, %s16_s13, [#allocation3], %s193_s22, %s193_s22, %s194_s23  }
  0x12   :  { %188 = dma.done.wait [#allocation3], 512  }
  0x13   :  { %189 = vsyncadd [#allocation3], 4294966784  ;;  %vm33_vm0 = vcmask 261120   ;;  %v29_v0 = vld [vmem:[#allocation2] sm:$0xff]  ;;  %v31_v1 = vld [vmem:[#allocation2 + $0x10] sm:$0xff] }
  0x14   :  { %v30_v2 = vld [vmem:[#allocation2 + $0x8] sm:$0xff]  ;;  %v34_v3 = vsel %vm33_vm0, %v29_v0, 0.0  ;;  %v40_v4 = vsel %vm33_vm0, %v31_v1, 0.0  ;;  %v32_v5 = vld [vmem:[#allocation2 + $0x18] sm:$0xff]  ;;  %v130_v41 = vld [vmem:[%s265_s1] ss:$0 sm:$0xff] }
  0x15   :  { %35 = vadd.xlane.f32.xlu0 %v34_v3  ;;  %41 = vadd.xlane.f32.xlu1 %v40_v4  ;;  %v37_v6 = vsel %vm33_vm0, %v30_v2, 0.0  ;;  %v43_v7 = vsel %vm33_vm0, %v32_v5, 0.0  ;;  %v131_v43 = vld [vmem:[%s266_s2] ss:$0 sm:$0xff]  ;;  %s195_s1 = smov [#allocation5]  }
  0x16   :  { %s118_s29 = sshll.u32 %s195_s1, 4  ;;  %s119_s29 = int_to_ptr.vmem [resolvable:$true] %s118_s29 }
  0x17   :  { %s166_s2 = scalar_lea.vmem %s119_s29, 512  ;;  %p171_p9 = scmp.lt.s32.totalorder %s119_s29, %s119_s29 }
  0x18   :  { %p167_p8 = scmp.ne.s32.totalorder %s119_s29, %s166_s2  ;;  %p172_p10 = scmp.lt.s32.totalorder %s166_s2, %s166_s2 }
  0x19   :  { %38 = vadd.xlane.f32.xlu0 %v37_v6  ;;  %44 = vadd.xlane.f32.xlu1 %v43_v7 }
  0x1a   :  { %p173_p11 = por %p172_p10, %p171_p9 }
  0x1c   :  { %p174_p12 = pnand %p173_p11, %p167_p8 }
  0xa2   :  { %v36_v8 = vpop.xlane.xlu0 %35  ;;  %v42_v9 = vpop.xlane.xlu1 %41 }
  0xa3   :  { %v47_v10 = vmul.f32 0.03125, %v36_v8  ;;  %v49_v11 = vmul.f32 0.03125, %v42_v9 }
  0xa5   :  { %v51_v12 = vsub.f32 %v29_v0, %v47_v10  ;;  %v53_v13 = vsub.f32 %v31_v1, %v49_v11 }
  0xa6   :  { %v39_v14 = vpop.xlane.xlu0 %38  ;;  %v45_v15 = vpop.xlane.xlu1 %44 }
  0xa7   :  { %v48_v16 = vmul.f32 0.03125, %v39_v14  ;;  %v50_v17 = vmul.f32 0.03125, %v45_v15  ;;  %v55_v18 = vmul.f32 %v51_v12, %v51_v12  ;;  %v57_v19 = vmul.f32 %v53_v13, %v53_v13 }
  0xa9   :  { %v52_v20 = vsub.f32 %v30_v2, %v48_v16  ;;  %v54_v21 = vsub.f32 %v32_v5, %v50_v17  ;;  %v59_v22 = vsel %vm33_vm0, %v55_v18, 0.0  ;;  %v65_v23 = vsel %vm33_vm0, %v57_v19, 0.0 }
  0xaa   :  { %60 = vadd.xlane.f32.xlu0 %v59_v22 }
  0xab   :  { %v56_v24 = vmul.f32 %v52_v20, %v52_v20  ;;  %v58_v25 = vmul.f32 %v54_v21, %v54_v21 }
  0xad   :  { %v62_v26 = vsel %vm33_vm0, %v56_v24, 0.0  ;;  %v68_v27 = vsel %vm33_vm0, %v58_v25, 0.0 }
  0xae   :  { %66 = vadd.xlane.f32.xlu0 %v65_v23  ;;  %63 = vadd.xlane.f32.xlu1 %v62_v26 }
  0xb2   :  { %69 = vadd.xlane.f32.xlu1 %v68_v27 }
 0x137   :  { %v61_v28 = vpop.xlane.xlu0 %60 }
 0x138   :  { %v71_v29 = vmul.f32 0.03125, %v61_v28 }
 0x13a   :  { %v75_v30 = vadd.f32 1e-05, %v71_v29 }
 0x13b   :  { %v64_v31 = vpop.xlane.xlu1 %63  ;;  %v67_v32 = vpop.xlane.xlu0 %66 }
 0x13c   :  { %136 = vrsqrt.f32 %v75_v30  ;;  %v72_v33 = vmul.f32 0.03125, %v64_v31  ;;  %v73_v34 = vmul.f32 0.03125, %v67_v32 }
 0x13e   :  { %v76_v35 = vadd.f32 1e-05, %v72_v33  ;;  %v77_v36 = vadd.f32 1e-05, %v73_v34 }
 0x13f   :  { %v70_v37 = vpop.xlane.xlu1 %69 }
 0x140   :  { %138 = vrsqrt.f32 %v76_v35  ;;  %v74_v38 = vmul.f32 0.03125, %v70_v37 }
 0x141   :  { %140 = vrsqrt.f32 %v77_v36 }
 0x142   :  { %v78_v39 = vadd.f32 1e-05, %v74_v38 }
 0x144   :  { %142 = vrsqrt.f32 %v78_v39 }
 0x146   :  { %v137_v40 = vpop.eup %136 }
 0x147   :  { %v83_v42 = vmul.f32 %v137_v40, %v51_v12 }
 0x149   :  { %v94_v44 = vmul.f32 %v130_v41, %v83_v42 }
 0x14a   :  { %v139_v45 = vpop.eup %138 }
 0x14b   :  { %v141_v46 = vpop.eup %140  ;;  %v84_v47 = vmul.f32 %v139_v45, %v52_v20  ;;  %v105_v48 = vadd.f32 %v131_v43, %v94_v44 }
 0x14c   :  { %v85_v49 = vmul.f32 %v141_v46, %v53_v13 }
 0x14d   :  { %v95_v50 = vmul.f32 %v130_v41, %v84_v47  ;;  %109 = vst.msk [vmem:[#allocation5] sm:$0xff] %vm33_vm0, %v105_v48 }
 0x14e   :  { %v143_v51 = vpop.eup %142  ;;  %v96_v52 = vmul.f32 %v130_v41, %v85_v49 }
 0x14f   :  { %v86_v53 = vmul.f32 %v143_v51, %v54_v21  ;;  %v106_v54 = vadd.f32 %v131_v43, %v95_v50 }
 0x150   :  { %v107_v55 = vadd.f32 %v131_v43, %v96_v52 }
 0x151   :  { %v97_v56 = vmul.f32 %v130_v41, %v86_v53  ;;  %110 = vst.msk [vmem:[#allocation5 + $0x8] sm:$0xff] %vm33_vm0, %v106_v54 }
 0x152   :  { %111 = vst.msk [vmem:[#allocation5 + $0x10] sm:$0xff] %vm33_vm0, %v107_v55 }
 0x153   :  { %v108_v57 = vadd.f32 %v131_v43, %v97_v56 }
 0x155   :  { %112 = vst.msk [vmem:[#allocation5 + $0x18] sm:$0xff] %vm33_vm0, %v108_v57 }
 0x156   :  { %177 = shalt.err (!%p174_p12)
}
 0x157   :  { %s178_s5 = scalar_lea.hbm %s267_s3, 512 }
 0x158   :  { %p179_p13 = scmp.ne.s32.totalorder %s267_s3, %s178_s5  ;;  %p182_p0 = scmp.lt.u32.totalorder %s178_s5, %s267_s3 }
 0x15a   :  { %p184_p1 = pnand %p182_p0, %p179_p13 }
 0x15c   :  { %187 = shalt.err (!%p184_p1)
}
 0x15d   :  { %124 = dma.vmem_to_hbm [thread:$0]  %s119_s29, 512, %s267_s3, [#allocation4], %s193_s22, %s193_s22, %s194_s23  }
 0x15e   :  { %190 = dma.done.wait [#allocation4], 512  }
 0x15f   :  { %191 = vsyncadd [#allocation4], 4294966784 }
 0x160   :  { %128 = vsyncpa [#allocation3], 1 }
 0x161   :  { %129 = vsyncpa [#allocation4], 1 }

</bundles_post_ra>
